<compile_context>
chip_gen: v5e
topology: v5e:2x2
jax: 0.10.0
libtpu: 0.0.40
codegen_flags: <defaults>
</compile_context>

<pallas_src>
import jax
import jax.numpy as jnp
from jax.experimental import pallas as pl
from jax.experimental.pallas import tpu as pltpu


def _round_up(a, b):
    return (a + b - 1) // b * b


def ffn_kernel(x_ref, w1_ref, b1_ref, w2_ref, b2_ref, o_ref, acc_ref):
    # x_ref: (tm, H)   w1_ref: (H, tih)   b1_ref: (1, tih)
    # w2_ref: (tih, H) b2_ref: (1, H)     o_ref: (tm, H)   acc_ref: (tm, H) f32
    k = pl.program_id(1)

    @pl.when(k == 0)
    def _():
        acc_ref[...] = jnp.zeros_like(acc_ref)

    # First GEMM slab over this inner-hidden tile, bias + ReLU in f32.
    h1 = jnp.dot(x_ref[...], w1_ref[...], preferred_element_type=jnp.float32)
    h1 = jnp.maximum(h1 + b1_ref[...], 0.0)
    # TODO(synk): training-mode dropout would use pltpu.prng_seed + pltpu.prng_random_bits;
    # eval-mode dropout is the identity, so nothing to do here.

    # Cast back to the weight dtype so the MXU gets native-width operands.
    h1 = h1.astype(w2_ref.dtype)

    # Accumulate the partial second GEMM in f32.
    acc_ref[...] += jnp.dot(h1, w2_ref[...], preferred_element_type=jnp.float32)

    @pl.when(k == pl.num_programs(1) - 1)
    def _():
        # Add the output bias exactly once, at finalize.
        o_ref[...] = (acc_ref[...] + b2_ref[...]).astype(o_ref.dtype)


def feed_forward(x, w1, b1, w2, b2, *, tm=None, tih=None):
    """x: (..., hidden). w1: (hidden, inner), b1: (inner,), w2: (inner, hidden), b2: (hidden,)."""
    orig_shape = x.shape
    H = orig_shape[-1]
    IH = w1.shape[1]
    x2d = x.reshape(-1, H)
    T = x2d.shape[0]

    # ---- tile selection (128/256-aligned where possible, bounded VMEM) ----
    if tm is None:
        tm = min(256, _round_up(T, 8))
    else:
        tm = max(8, _round_up(tm, 8))
    T_pad = _round_up(T, tm)

    if tih is None:
        tih = min(512, IH)
    if tih < IH:
        tih = _round_up(tih, 128)   # lane constraint when not the full IH extent
    tih = min(tih, _round_up(IH, 128)) if tih < IH else tih
    if tih >= IH:
        tih = IH
        IH_pad = IH
    else:
        IH_pad = _round_up(IH, tih)

    # ---- zero padding (exact: padded inner units contribute relu(0)=0) ----
    if T_pad != T:
        x2d = jnp.pad(x2d, ((0, T_pad - T), (0, 0)))
    if IH_pad != IH:
        w1 = jnp.pad(w1, ((0, 0), (0, IH_pad - IH)))
        b1 = jnp.pad(b1, ((0, IH_pad - IH),))
        w2 = jnp.pad(w2, ((0, IH_pad - IH), (0, 0)))

    b1_2d = b1.reshape(1, IH_pad)
    b2_2d = b2.reshape(1, H)

    n_t = T_pad // tm
    n_k = IH_pad // tih

    # ---- VMEM budget -> explicit scoped limit (double-buffered streams + f32 acc) ----
    def _isz(a):
        return jnp.dtype(a.dtype).itemsize

    budget = (
        tm * H * 4                                         # accumulator (f32)
        + 2 * tm * H * _isz(x2d)                           # x tile, double-buffered
        + 2 * (H * tih * _isz(w1) + tih * H * _isz(w2))    # weight tiles, double-buffered
        + 2 * (tih * _isz(b1) + H * _isz(b2))              # bias tiles
        + 2 * tm * H * _isz(x2d)                           # output tile, double-buffered
    )
    vmem_limit = int(min(64 * 1024 * 1024, max(16 * 1024 * 1024, 3 * budget)))

    # ---- advisory cost estimate (helps XLA schedule around the call) ----
    flops = 4 * T_pad * H * IH_pad                         # two GEMMs, 2*M*N*K each
    bytes_accessed = (
        T_pad * H * _isz(x2d) * 2                          # read x + write out
        + n_t * (H * IH_pad * _isz(w1) + IH_pad * H * _isz(w2))  # weights per token tile
        + n_t * (IH_pad * _isz(b1) + H * _isz(b2))
    )

    out = pl.pallas_call(
        ffn_kernel,
        out_shape=jax.ShapeDtypeStruct((T_pad, H), x.dtype),
        grid_spec=pltpu.PrefetchScalarGridSpec(
            num_scalar_prefetch=0,
            grid=(n_t, n_k),
            in_specs=[
                pl.BlockSpec((tm, H), lambda i, k: (i, 0)),     # x
                pl.BlockSpec((H, tih), lambda i, k: (0, k)),    # w1 tile
                pl.BlockSpec((1, tih), lambda i, k: (0, k)),    # b1 tile
                pl.BlockSpec((tih, H), lambda i, k: (k, 0)),    # w2 tile
                pl.BlockSpec((1, H), lambda i, k: (0, 0)),      # b2 (constant)
            ],
            out_specs=pl.BlockSpec((tm, H), lambda i, k: (i, 0)),
            scratch_shapes=[pltpu.VMEM((tm, H), jnp.float32)],
        ),
        compiler_params=pltpu.CompilerParams(
            dimension_semantics=("parallel", "arbitrary"),
            vmem_limit_bytes=vmem_limit,
        ),
        cost_estimate=pl.CostEstimate(
            flops=flops, bytes_accessed=bytes_accessed, transcendentals=0
        ),
    )(x2d, w1, b1_2d, w2, b2_2d)

    return out[:T].reshape(orig_shape)


def _make_params(key, H, IH, dtype=jnp.float32):
    kw1, kb1, kw2, kb2 = jax.random.split(key, 4)
    bound1 = 1.0 / (H ** 0.5)
    w1 = jax.random.uniform(kw1, (H, IH), minval=-bound1, maxval=bound1, dtype=dtype)
    b1 = jax.random.uniform(kb1, (IH,), minval=-bound1, maxval=bound1, dtype=dtype)
    bound2 = 1.0 / (IH ** 0.5)
    w2 = jax.random.uniform(kw2, (IH, H), minval=-bound2, maxval=bound2, dtype=dtype)
    b2 = jax.random.uniform(kb2, (H,), minval=-bound2, maxval=bound2, dtype=dtype)
    return w1, b1, w2, b2


if __name__ == "__main__":
    key = jax.random.PRNGKey(0)
    k1, k2, k3, k4 = jax.random.split(key, 4)

    # Test 1: module-scale shapes (batch=2, seq=8, hidden=32, inner_hidden=64), single tile.
    B, S, H, IH = 2, 8, 32, 64
    x = jax.random.normal(k1, (B, S, H), dtype=jnp.float32)
    w1, b1, w2, b2 = _make_params(k2, H, IH)
    out = jax.block_until_ready(feed_forward(x, w1, b1, w2, b2))
    ref = jnp.maximum(x @ w1 + b1, 0.0) @ w2 + b2
    assert out.shape == (B, S, H)
    assert jnp.allclose(out, ref, atol=1e-5, rtol=1e-5)

    # Test 2: exercises the tiled reduction (multiple IH tiles), multiple token tiles,
    # and ragged-token zero padding.
    B2, S2, H2, IH2 = 2, 7, 32, 256   # T=14 -> padded to 16 with tm=8; IH tiled as 2x128
    x2 = jax.random.normal(k3, (B2, S2, H2), dtype=jnp.float32)
    w1b, b1b, w2b, b2b = _make_params(k4, H2, IH2)
    out2 = jax.block_until_ready(feed_forward(x2, w1b, b1b, w2b, b2b, tm=8, tih=128))
    ref2 = jnp.maximum(x2 @ w1b + b1b, 0.0) @ w2b + b2b
    assert out2.shape == (B2, S2, H2)
    assert jnp.allclose(out2, ref2, atol=1e-5, rtol=1e-5)

    print("KERNEL_OK")
</pallas_src>

<mosaic_0001>
module attributes {stable_mosaic.version = 11 : i64} {
  func.func @ffn_kernel(%arg0: i32, %arg1: i32, %arg2: memref<16x32xf32, #tpu.memory_space<vmem>>, %arg3: memref<32x64xf32, #tpu.memory_space<vmem>>, %arg4: memref<1x64xf32, #tpu.memory_space<vmem>>, %arg5: memref<64x32xf32, #tpu.memory_space<vmem>>, %arg6: memref<1x32xf32, #tpu.memory_space<vmem>>, %arg7: memref<16x32xf32, #tpu.memory_space<vmem>>, %arg8: memref<16x32xf32, #tpu.memory_space<vmem>>) attributes {dimension_semantics = [#tpu.dimension_semantics<parallel>, #tpu.dimension_semantics<arbitrary>], iteration_bounds = array<i64: 1, 1>, scalar_prefetch = 0 : i64, scratch_operands = 1 : i64, tpu.core_type = #tpu.core_type<tc>, window_params = [{transform_indices = @transform_0, window_bounds = array<i64: 16, 32>}, {transform_indices = @transform_1, window_bounds = array<i64: 32, 64>}, {transform_indices = @transform_2, window_bounds = array<i64: 1, 64>}, {transform_indices = @transform_3, window_bounds = array<i64: 64, 32>}, {pipeline_mode = #tpu.pipeline_mode<synchronous>, transform_indices = @transform_4, window_bounds = array<i64: 1, 32>}, {transform_indices = @transform_5, window_bounds = array<i64: 16, 32>}]} {
    %c0_i32 = arith.constant 0 : i32
    %0 = arith.cmpi eq, %arg1, %c0_i32 : i32
    %1 = arith.extui %0 : i1 to i32
    %c0_i32_0 = arith.constant 0 : i32
    %2 = arith.cmpi ne, %1, %c0_i32_0 : i32
    scf.if %2 {
      %cst_16 = arith.constant 0.000000e+00 : f32
      %19 = vector.broadcast %cst_16 : f32 to vector<16x32xf32>
      %c0_17 = arith.constant 0 : index
      %c0_18 = arith.constant 0 : index
      %20 = vector.load %arg8[%c0_17, %c0_18] : memref<16x32xf32, #tpu.memory_space<vmem>>, vector<16x32xf32>
      tpu.vector_store %arg8[%c0_17, %c0_18], %19 {strides = array<i32>} : memref<16x32xf32, #tpu.memory_space<vmem>>, vector<16x32xf32>,
    } else {
    }
    %c0 = arith.constant 0 : index
    %c0_1 = arith.constant 0 : index
    %3 = vector.load %arg2[%c0, %c0_1] : memref<16x32xf32, #tpu.memory_space<vmem>>, vector<16x32xf32>
    %c0_2 = arith.constant 0 : index
    %c0_3 = arith.constant 0 : index
    %4 = vector.load %arg3[%c0_2, %c0_3] : memref<32x64xf32, #tpu.memory_space<vmem>>, vector<32x64xf32>
    %cst = arith.constant dense<0.000000e+00> : vector<16x64xf32>
    %5 = tpu.matmul %3, %4, %cst {dimension_numbers = #tpu.dot_dimension_numbers<[1], [0], [0], [1], [0, 0, 1, 1], [], []>} : vector<16x32xf32>, vector<32x64xf32>, vector<16x64xf32> -> vector<16x64xf32>
    %c0_4 = arith.constant 0 : index
    %c0_5 = arith.constant 0 : index
    %6 = vector.load %arg4[%c0_4, %c0_5] : memref<1x64xf32, #tpu.memory_space<vmem>>, vector<1x64xf32>
    %7 = vector.broadcast %6 : vector<1x64xf32> to vector<16x64xf32>
    %8 = arith.addf %5, %7 : vector<16x64xf32>
    %cst_6 = arith.constant 0.000000e+00 : f32
    %9 = vector.broadcast %cst_6 : f32 to vector<16x64xf32>
    %10 = arith.maximumf %8, %9 : vector<16x64xf32>
    %c0_7 = arith.constant 0 : index
    %c0_8 = arith.constant 0 : index
    %11 = vector.load %arg8[%c0_7, %c0_8] : memref<16x32xf32, #tpu.memory_space<vmem>>, vector<16x32xf32>
    %c0_9 = arith.constant 0 : index
    %c0_10 = arith.constant 0 : index
    %12 = vector.load %arg5[%c0_9, %c0_10] : memref<64x32xf32, #tpu.memory_space<vmem>>, vector<64x32xf32>
    %cst_11 = arith.constant dense<0.000000e+00> : vector<16x32xf32>
    %13 = tpu.matmul %10, %12, %cst_11 {dimension_numbers = #tpu.dot_dimension_numbers<[1], [0], [0], [1], [0, 0, 1, 1], [], []>} : vector<16x64xf32>, vector<64x32xf32>, vector<16x32xf32> -> vector<16x32xf32>
    %14 = arith.addf %11, %13 : vector<16x32xf32>
    %c0_12 = arith.constant 0 : index
    %c0_13 = arith.constant 0 : index
    %15 = vector.load %arg8[%c0_12, %c0_13] : memref<16x32xf32, #tpu.memory_space<vmem>>, vector<16x32xf32>
    tpu.vector_store %arg8[%c0_12, %c0_13], %14 {strides = array<i32>} : memref<16x32xf32, #tpu.memory_space<vmem>>, vector<16x32xf32>,
    %c0_i32_14 = arith.constant 0 : i32
    %16 = arith.cmpi eq, %arg1, %c0_i32_14 : i32
    %17 = arith.extui %16 : i1 to i32
    %c0_i32_15 = arith.constant 0 : i32
    %18 = arith.cmpi ne, %17, %c0_i32_15 : i32
    scf.if %18 {
      %c0_16 = arith.constant 0 : index
      %c0_17 = arith.constant 0 : index
      %19 = vector.load %arg8[%c0_16, %c0_17] : memref<16x32xf32, #tpu.memory_space<vmem>>, vector<16x32xf32>
      %c0_18 = arith.constant 0 : index
      %c0_19 = arith.constant 0 : index
      %20 = vector.load %arg6[%c0_18, %c0_19] : memref<1x32xf32, #tpu.memory_space<vmem>>, vector<1x32xf32>
      %21 = vector.broadcast %20 : vector<1x32xf32> to vector<16x32xf32>
      %22 = arith.addf %19, %21 : vector<16x32xf32>
      %c0_20 = arith.constant 0 : index
      %c0_21 = arith.constant 0 : index
      %23 = vector.load %arg7[%c0_20, %c0_21] : memref<16x32xf32, #tpu.memory_space<vmem>>, vector<16x32xf32>
      tpu.vector_store %arg7[%c0_20, %c0_21], %22 {strides = array<i32>} : memref<16x32xf32, #tpu.memory_space<vmem>>, vector<16x32xf32>,
    } else {
    }
    return
  }
  func.func @transform_0(%arg0: i32, %arg1: i32) -> (i32, i32) {
    %c0_i32 = arith.constant 0 : i32
    %c0_i32_0 = arith.constant 0 : i32
    return %arg0, %c0_i32 : i32, i32
  }
  func.func @transform_1(%arg0: i32, %arg1: i32) -> (i32, i32) {
    %c0_i32 = arith.constant 0 : i32
    %c0_i32_0 = arith.constant 0 : i32
    return %c0_i32, %arg1 : i32, i32
  }
  func.func @transform_2(%arg0: i32, %arg1: i32) -> (i32, i32) {
    %c0_i32 = arith.constant 0 : i32
    %c0_i32_0 = arith.constant 0 : i32
    return %c0_i32, %arg1 : i32, i32
  }
  func.func @transform_3(%arg0: i32, %arg1: i32) -> (i32, i32) {
    %c0_i32 = arith.constant 0 : i32
    %c0_i32_0 = arith.constant 0 : i32
    return %arg1, %c0_i32 : i32, i32
  }
  func.func @transform_4(%arg0: i32, %arg1: i32) -> (i32, i32) {
    %c0_i32 = arith.constant 0 : i32
    %c0_i32_0 = arith.constant 0 : i32
    %c0_i32_1 = arith.constant 0 : i32
    return %c0_i32, %c0_i32_0 : i32, i32
  }
  func.func @transform_5(%arg0: i32, %arg1: i32) -> (i32, i32) {
    %c0_i32 = arith.constant 0 : i32
    %c0_i32_0 = arith.constant 0 : i32
    return %arg0, %c0_i32 : i32, i32
  }
}

</mosaic_0001>

<bundles_post_ra>
// kernel: tpu_custom_call.1
= control target key start
LH: loop header
LB: loop body
LE: loop exit
PB: predicated region body
PF: predicated region fallthrough
CT: control target
= control target key end

     0   :  { %s286_s0 = inlined_call_operand.vmem [shape: f32[16,32], index: 0, kind: input, shape index: {}]   ;;  %s287_s1 = inlined_call_operand.vmem [shape: f32[32,64], index: 1, kind: input, shape index: {}]   ;;  %s288_s2 = inlined_call_operand.vmem [shape: f32[1,64], index: 2, kind: input, shape index: {}]   ;;  %s289_s3 = inlined_call_operand.vmem [shape: f32[64,32], index: 3, kind: input, shape index: {}]   ;;  %s290_s4 = inlined_call_operand.vmem [shape: f32[1,32], index: 4, kind: input, shape index: {}]   ;;  %s291_s5 = inlined_call_operand.hbm [shape: f32[16,32], index: 5, kind: output, shape index: {}]  }
   0x1   :  { %v33_v0 = vld [vmem:[%s287_s1 + $0x18] sm:$0xff]  ;;  %v32_v1 = vld [vmem:[%s287_s1 + $0x10] sm:$0xff]  ;;  %v31_v2 = vld [vmem:[%s287_s1 + $0x8] sm:$0xff] }
   0x2   :  { %149 = vmatpush.msra.mxu3 %v33_v0  ;;  %57 = vmatpush.msra.mxu0 %v33_v0  ;;  %v79_v3 = vld [vmem:[%s289_s3 + $0x38] sm:$0xff]  ;;  %v78_v4 = vld [vmem:[%s289_s3 + $0x30] sm:$0xff]  ;;  %v30_v5 = vld [vmem:[%s287_s1] sm:$0xff] }
   0x3   :  { %153 = vmatpush.msra.mxu2 %v79_v3  ;;  %95 = vmatpush.msra.mxu1 %v79_v3 }
   0x4   :  { %150 = vmatpush.msra.mxu3 %v32_v1  ;;  %58 = vmatpush.msra.mxu0 %v32_v1 }
   0x5   :  { %10 = vsyncpa [#allocation4], 0  ;;  %vm25_vm0 = vcmask 261120   ;;  %v29_v6 = vld [vmem:[%s286_s0 + $0x8] sm:$0xff]  ;;  %v28_v7 = vld [vmem:[%s286_s0] sm:$0xff]  ;;  %154 = vmatpush.msra.mxu2 %v78_v4  ;;  %96 = vmatpush.msra.mxu1 %v78_v4  ;;  %v193_v14 = vmov 0.0  }
   0x6   :  { %151 = vmatpush.msra.mxu3 %v31_v2  ;;  %59 = vmatpush.msra.mxu0 %v31_v2  ;;  %v77_v8 = vld [vmem:[%s289_s3 + $0x28] sm:$0xff]  ;;  %v76_v9 = vld [vmem:[%s289_s3 + $0x20] sm:$0xff]  ;;  %v75_v10 = vld [vmem:[%s289_s3 + $0x18] sm:$0xff]  ;;  %26 = vst.msk [vmem:[#allocation2] sm:$0xff] %vm25_vm0, %v193_v14  ;;  %vm80_vm1 = vcmask 523264   ;;  %s133_s25 = sshll.u32 %s291_s5, 4  ;;  %s134_s25 = int_to_ptr.hbm [resolvable:$true] %s133_s25 }
   0x7   :  { %155 = vmatpush.msra.mxu2 %v77_v8  ;;  %97 = vmatpush.msra.mxu1 %v77_v8  ;;  %v74_v11 = vld [vmem:[%s289_s3 + $0x10] sm:$0xff]  ;;  %v73_v12 = vld [vmem:[%s289_s3 + $0x8] sm:$0xff]  ;;  %v72_v13 = vld [vmem:[%s289_s3] sm:$0xff]  ;;  %27 = vst.msk [vmem:[#allocation2 + $0x8] sm:$0xff] %vm25_vm0, %v193_v14  ;;  %s196_s26 = smov 8  }
   0x8   :  { %152 = vmatpush.msra.mxu3 %v30_v5  ;;  %60 = vmatpush.msra.mxu0 %v30_v5  ;;  %v165_v15 = vld [vmem:[%s288_s2] ss:$0 sm:$0xff]  ;;  %s194_s2 = smov [#allocation3]  }
   0x9   :  { %146 = vmatmul.msk.f32.vlgmr.msra.gmra.mxu3 %vm25_vm0, %v29_v6  ;;  %145 = vmatmul.msk.f32.vlgmr.msra.gmra.mxu0 %vm25_vm0, %v28_v7  ;;  %v166_v25 = vld [vmem:[%s290_s4] ss:$0 sm:$0xff]  ;;  %s131_s22 = sshll.u32 %s194_s2, 4  ;;  %s195_s4 = smov 128   ;;  %s132_s22 = int_to_ptr.vmem [resolvable:$true] %s131_s22 }
   0xa   :  { %156 = vmatpush.msra.mxu2 %v76_v9  ;;  %98 = vmatpush.msra.mxu1 %v76_v9 }
   0xc   :  { %157 = vmatpush.msra.mxu2 %v75_v10  ;;  %99 = vmatpush.msra.mxu1 %v75_v10 }
   0xd   :  { %v70_v22 = vld [vmem:[#allocation2] sm:$0xff] }
   0xe   :  { %158 = vmatpush.msra.mxu2 %v74_v11  ;;  %100 = vmatpush.msra.mxu1 %v74_v11  ;;  %v71_v26 = vld [vmem:[#allocation2 + $0x8] sm:$0xff] }
  0x10   :  { %159 = vmatpush.msra.mxu2 %v73_v12  ;;  %101 = vmatpush.msra.mxu1 %v73_v12 }
  0x12   :  { %160 = vmatpush.msra.mxu2 %v72_v13  ;;  %102 = vmatpush.msra.mxu1 %v72_v13 }
  0x86   :  { %v62_v16 = vpop.f32.mrf.mxu0 }
  0x87   :  { %v63_v17 = vadd.f32 %v165_v15, %v62_v16 }
  0x89   :  { %v68_v18 = vmax.f32 %v63_v17, 0.0 }
  0x8b   :  { %147 = vmatmul.msk.f32.vlgmr.msra.gmra.mxu1 %vm80_vm1, %v68_v18 }
  0x8c   :  { %v65_v19 = vpop.f32.mrf.mxu3 }
  0x8d   :  { %v66_v20 = vadd.f32 %v165_v15, %v65_v19 }
  0x8f   :  { %v69_v21 = vmax.f32 %v66_v20, 0.0 }
  0x91   :  { %148 = vmatmul.msk.f32.vlgmr.msra.gmra.mxu2 %vm80_vm1, %v69_v21 }
 0x108   :  { %v104_v23 = vpop.f32.mrf.mxu1 }
 0x109   :  { %v110_v24 = vadd.f32 %v104_v23, %v70_v22 }
 0x10b   :  { %112 = vst.msk [vmem:[#allocation2] sm:$0xff] %vm25_vm0, %v110_v24 }
 0x112   :  { %v117_v27 = vld [vmem:[#allocation2] sm:$0xff] }
 0x113   :  { %v123_v28 = vadd.f32 %v166_v25, %v117_v27 }
 0x114   :  { %v107_v29 = vpop.f32.mrf.mxu2 }
 0x115   :  { %v111_v30 = vadd.f32 %v107_v29, %v71_v26  ;;  %125 = vst.msk [vmem:[#allocation3] sm:$0xff] %vm25_vm0, %v123_v28 }
 0x117   :  { %113 = vst.msk [vmem:[#allocation2 + $0x8] sm:$0xff] %vm25_vm0, %v111_v30 }
 0x11e   :  { %v118_v31 = vld [vmem:[#allocation2 + $0x8] sm:$0xff] }
 0x11f   :  { %v124_v32 = vadd.f32 %v166_v25, %v118_v31 }
 0x121   :  { %126 = vst.msk [vmem:[#allocation3 + $0x8] sm:$0xff] %vm25_vm0, %v124_v32 }
 0x122   :  { %139 = dma.vmem_to_hbm [thread:$0]  %s132_s22, 256, %s134_s25, [#allocation4], %s195_s4, %s195_s4, %s196_s26  }
 0x123   :  { %191 = dma.done.wait [#allocation4], 256  }
 0x124   :  { %192 = vsyncadd [#allocation4], 4294967040 }
 0x125   :  { %144 = vsyncpa [#allocation4], 1 }

</bundles_post_ra>
